<compile_context>
chip_gen: v7x
topology: tpu7x:2x2x1
jax: 0.10.0
libtpu: 0.0.40
codegen_flags: <defaults>
</compile_context>

<pallas_src>
import math

import jax
import jax.numpy as jnp
import numpy as np
from jax import lax
from jax.experimental import pallas as pl
from jax.experimental.pallas import tpu as pltpu

LOG_STD_MAX = 2.0
LOG_STD_MIN = -20.0


def _round_up(a, b):
    return (a + b - 1) // b * b


def _posterior_and_terms(x, mu, logstd, mix_logit):
    """Shared GMM math. x:(B,Z) mu:(M,Z) logstd:(1,Z) mix_logit:(1,M), all f32.

    Returns posterior (B,M), log_comp (B,M), log_post (B,M), log_mix (1,M).
    """
    B, Z = x.shape
    M = mu.shape[0]

    inv_var = jnp.exp(-2.0 * logstd)                              # (1, Z)

    # Center x and mu by the centroid mean: (x - mu) = (x - c) - (mu - c).
    # This keeps magnitudes small when x ~ mu with large |x|, mitigating the
    # catastrophic cancellation of the expanded quadratic form below.
    c = jnp.mean(mu, axis=0, keepdims=True)                       # (1, Z)
    xc = x - c                                                    # (B, Z)
    muc = mu - c                                                  # (M, Z)

    # quad[b,m] = sum_z (xc[b,z]-muc[m,z])^2 * inv_var[z]
    #           = sum_z xc^2*inv_var - 2*sum_z xc*muc*inv_var + sum_z muc^2*inv_var
    # First two terms folded into a single MXU pass (K = 2Z), contracted over
    # the last dims so no transpose of mu is materialized.
    # NOTE(MXU shape): at M=16, Z=32 this under-fills the MXU (fine: the kernel
    # is HBM-bound at ~3 FLOP/byte).  If M or Z grow, pad M to a multiple of
    # 128 (mask padded components to -inf before the softmax) and feed bf16
    # operands with preferred_element_type=f32.
    lhs = jnp.concatenate([xc * xc, xc], axis=-1)                 # (B, 2Z)
    rhs = jnp.concatenate(
        [jnp.broadcast_to(inv_var, (M, Z)), -2.0 * muc * inv_var], axis=-1)  # (M, 2Z)
    quad = lax.dot_general(
        lhs, rhs, dimension_numbers=(((1,), (1,)), ((), ())),
        preferred_element_type=jnp.float32)                       # (B, M)

    # + per-component constant sum_z muc^2 * inv_var as (1, M), transpose-free.
    mq = lax.dot_general(
        inv_var, muc * muc, dimension_numbers=(((1,), (1,)), ((), ())),
        preferred_element_type=jnp.float32)                       # (1, M)
    quad = jnp.maximum(quad + mq, 0.0)   # clamp tiny negative rounding noise

    # Normal(mu, std).log_prob(x).sum(-1) = -0.5*quad - sum(logstd) - Z/2*log(2pi)
    log_norm = jnp.sum(logstd) + 0.5 * Z * math.log(2.0 * math.pi)
    log_comp = -0.5 * quad - log_norm                             # (B, M)

    # log_softmax over mixture logits.
    mmax = jnp.max(mix_logit, axis=-1, keepdims=True)
    mlse = mmax + jnp.log(jnp.sum(jnp.exp(mix_logit - mmax), axis=-1, keepdims=True))
    log_mix = mix_logit - mlse                                    # (1, M)

    s = log_comp + log_mix
    smax = jnp.max(s, axis=-1, keepdims=True)
    log_px = smax + jnp.log(jnp.sum(jnp.exp(s - smax), axis=-1, keepdims=True))
    log_post = s - log_px
    posterior = jnp.exp(log_post)                                 # (B, M)
    return posterior, log_comp, log_post, log_mix


def cluster_fwd_elbo_kernel(x_ref, mean_ref, logstd_ref, mixlogit_ref,
                            post_ref, clp_ref, ldkl_ref):
    x = x_ref[...]
    mu = mean_ref[...]
    logstd = jnp.clip(logstd_ref[...], LOG_STD_MIN, LOG_STD_MAX)
    mix_logit = mixlogit_ref[...]

    posterior, log_comp, log_post, log_mix = _posterior_and_terms(
        x, mu, logstd, mix_logit)

    log_data = jnp.sum(posterior * log_comp, axis=-1, keepdims=True)          # (B,1)
    # KL(Cat(posterior) || Cat(softmax(mix_logit))); log_post is finite by
    # construction so no 0*(-inf) guard is needed.
    kl = jnp.sum(posterior * (log_post - log_mix), axis=-1, keepdims=True)    # (B,1)

    # Lane-exact outputs (no zero padding, no broadcasts): minimizes HBM
    # writeback bytes, which dominate traffic for this mem-bound kernel.
    post_ref[...] = posterior
    clp_ref[...] = log_comp
    ldkl_ref[...] = jnp.concatenate([log_data, kl], axis=-1)                  # (B,2)


def cluster_fwd_posterior_kernel(x_ref, mean_ref, logstd_ref, mixlogit_ref, post_ref):
    x = x_ref[...]
    mu = mean_ref[...]
    logstd = jnp.clip(logstd_ref[...], LOG_STD_MIN, LOG_STD_MAX)
    mix_logit = mixlogit_ref[...]

    posterior, _, _, _ = _posterior_and_terms(x, mu, logstd, mix_logit)
    post_ref[...] = posterior


def cluster_forward(x, comp_mean, comp_logstd, mix_logit, with_elbo=True,
                    batch_tile=1024):
    """JAX/Pallas equivalent of Cluster.forward(x, with_elbo)."""
    x = jnp.asarray(x, jnp.float32)
    if x.ndim == 1:
        x = x[None, :]
    B, Z = x.shape
    comp_mean = jnp.asarray(comp_mean, jnp.float32)
    M = comp_mean.shape[0]
    comp_logstd = jnp.asarray(comp_logstd, jnp.float32).reshape(1, Z)
    mix2d = jnp.asarray(mix_logit, jnp.float32).reshape(1, M)

    # Batch tile: sublane-aligned, capped so that for B >= 16 the grid always
    # has >= 2 steps (lets the "parallel" axis shard over v7x's 2 TensorCores;
    # no effect on single-TC v5e/v6e).  Ragged last tiles are handled by
    # Pallas boundary blocks (partial reads, masked writes) -- no x copy.
    TB = min(batch_tile, _round_up(B, 8))
    if B >= 16:
        TB = min(TB, _round_up(-(-B // 2), 8))
    grid = (pl.cdiv(B, TB),)

    in_specs = [
        pl.BlockSpec((TB, Z), lambda i: (i, 0)),   # x tile
        pl.BlockSpec((M, Z), lambda i: (0, 0)),    # comp_mean (VMEM-resident)
        pl.BlockSpec((1, Z), lambda i: (0, 0)),    # comp_logstd (resident)
        pl.BlockSpec((1, M), lambda i: (0, 0)),    # mix_logit (resident)
    ]

    # Generous cap on the real VMEM footprint (double-buffered x + outputs +
    # params + compiler scratch); explicit headroom, esp. on v7x (64 MiB phys).
    vmem_limit_bytes = int(min(128 << 20, max(8 << 20, 64 * TB * (Z + 2 * M + 8))))
    compiler_params = pltpu.CompilerParams(
        dimension_semantics=("parallel",),
        vmem_limit_bytes=vmem_limit_bytes)

    flops = 4 * B * M * Z + 16 * B * M
    transcendentals = 2 * B * M + 4 * B + 2 * M

    if with_elbo:
        bytes_accessed = 4 * (B * Z + M * Z + Z + M + B * (2 * M + 2))
        posterior, comp_log_prob, ld_kl = pl.pallas_call(
            cluster_fwd_elbo_kernel,
            out_shape=(
                jax.ShapeDtypeStruct((B, M), jnp.float32),
                jax.ShapeDtypeStruct((B, M), jnp.float32),
                jax.ShapeDtypeStruct((B, 2), jnp.float32),
            ),
            grid=grid,
            in_specs=in_specs,
            out_specs=(
                pl.BlockSpec((TB, M), lambda i: (i, 0)),
                pl.BlockSpec((TB, M), lambda i: (i, 0)),
                pl.BlockSpec((TB, 2), lambda i: (i, 0)),
            ),
            compiler_params=compiler_params,
            cost_estimate=pl.CostEstimate(
                flops=flops, transcendentals=transcendentals,
                bytes_accessed=bytes_accessed),
        )(x, comp_mean, comp_logstd, mix2d)
        return posterior, dict(
            comp_log_prob=comp_log_prob,
            log_data=ld_kl[:, 0],
            kl_from_prior=ld_kl[:, 1],
        )
    else:
        bytes_accessed = 4 * (B * Z + M * Z + Z + M + B * M)
        posterior = pl.pallas_call(
            cluster_fwd_posterior_kernel,
            out_shape=jax.ShapeDtypeStruct((B, M), jnp.float32),
            grid=grid,
            in_specs=in_specs,
            out_specs=pl.BlockSpec((TB, M), lambda i: (i, 0)),
            compiler_params=compiler_params,
            cost_estimate=pl.CostEstimate(
                flops=flops, transcendentals=transcendentals,
                bytes_accessed=bytes_accessed),
        )(x, comp_mean, comp_logstd, mix2d)
        return posterior


def _reference_forward(x, comp_mean, comp_logstd, mix_logit):
    """Pure-JAX reference mirroring the PyTorch forward."""
    log_mix = jax.nn.log_softmax(mix_logit)[None, :]                   # (1, M)
    logstd = jnp.clip(comp_logstd, LOG_STD_MIN, LOG_STD_MAX)           # (1, Z)
    std = jnp.exp(logstd)
    xe = x[:, None, :]                                                 # (B, 1, Z)
    log_comp = jnp.sum(
        -((xe - comp_mean[None]) ** 2) / (2.0 * std ** 2)
        - logstd - 0.5 * jnp.log(2.0 * jnp.pi), axis=-1)               # (B, M)
    s = log_comp + log_mix
    log_px = jax.scipy.special.logsumexp(s, axis=-1, keepdims=True)
    log_post = s - log_px
    post = jnp.exp(log_post)
    log_data = jnp.sum(post * log_comp, axis=-1)
    kl = jnp.sum(post * (log_post - log_mix), axis=-1)
    return post, log_comp, log_data, kl


if __name__ == "__main__":
    # args.n_latent_landmarks = 16, args.embed_size = 32, batch = 8
    N_MIX, Z_DIM, BATCH = 16, 32, 8

    key = jax.random.PRNGKey(0)
    k1, k2, k3, k4, k5 = jax.random.split(key, 5)

    # Deterministic parameter init matching Cluster.__init__ distributions.
    comp_mean = jax.random.normal(k1, (N_MIX, Z_DIM), jnp.float32) * np.sqrt(1.0 / N_MIX)
    comp_logstd = jax.random.normal(k2, (1, Z_DIM), jnp.float32) * (1.0 / np.e)
    mix_logit = jnp.ones((N_MIX,), jnp.float32)

    x = jax.random.normal(k3, (BATCH, Z_DIM), jnp.float32)

    # --- with_elbo=True path ---
    posterior, elbo = cluster_forward(x, comp_mean, comp_logstd, mix_logit, with_elbo=True)
    jax.block_until_ready(posterior)
    jax.block_until_ready(elbo["kl_from_prior"])

    ref_post, ref_clp, ref_ld, ref_kl = _reference_forward(x, comp_mean, comp_logstd, mix_logit)
    assert np.allclose(np.asarray(posterior), np.asarray(ref_post), rtol=1e-4, atol=1e-5)
    assert np.allclose(np.asarray(elbo["comp_log_prob"]), np.asarray(ref_clp), rtol=1e-4, atol=1e-4)
    assert np.allclose(np.asarray(elbo["log_data"]), np.asarray(ref_ld), rtol=1e-4, atol=1e-4)
    assert np.allclose(np.asarray(elbo["kl_from_prior"]), np.asarray(ref_kl), rtol=1e-4, atol=1e-5)

    # --- with_elbo=False path (posterior-only kernel) ---
    post_only = cluster_forward(x, comp_mean, comp_logstd, mix_logit, with_elbo=False)
    jax.block_until_ready(post_only)
    assert np.allclose(np.asarray(post_only), np.asarray(ref_post), rtol=1e-4, atol=1e-5)

    # --- non-multiple-of-8 batch exercises the ragged boundary-block path ---
    x5 = jax.random.normal(k4, (5, Z_DIM), jnp.float32)
    p5, e5 = cluster_forward(x5, comp_mean, comp_logstd, mix_logit, with_elbo=True)
    jax.block_until_ready(p5)
    r5_post, r5_clp, r5_ld, r5_kl = _reference_forward(x5, comp_mean, comp_logstd, mix_logit)
    assert np.allclose(np.asarray(p5), np.asarray(r5_post), rtol=1e-4, atol=1e-5)
    assert np.allclose(np.asarray(e5["comp_log_prob"]), np.asarray(r5_clp), rtol=1e-4, atol=1e-4)
    assert np.allclose(np.asarray(e5["log_data"]), np.asarray(r5_ld), rtol=1e-4, atol=1e-4)
    assert np.allclose(np.asarray(e5["kl_from_prior"]), np.asarray(r5_kl), rtol=1e-4, atol=1e-5)

    # --- batch >= 16 exercises the multi-step (>= 2 TensorCore) grid path ---
    x64 = jax.random.normal(k5, (64, Z_DIM), jnp.float32)
    p64, e64 = cluster_forward(x64, comp_mean, comp_logstd, mix_logit, with_elbo=True)
    jax.block_until_ready(p64)
    r64_post, r64_clp, r64_ld, r64_kl = _reference_forward(x64, comp_mean, comp_logstd, mix_logit)
    assert np.allclose(np.asarray(p64), np.asarray(r64_post), rtol=1e-4, atol=1e-5)
    assert np.allclose(np.asarray(e64["log_data"]), np.asarray(r64_ld), rtol=1e-4, atol=1e-4)
    assert np.allclose(np.asarray(e64["kl_from_prior"]), np.asarray(r64_kl), rtol=1e-4, atol=1e-5)

    print("KERNEL_OK")
</pallas_src>

<mosaic_0001>
module attributes {stable_mosaic.version = 11 : i64} {
  func.func @cluster_fwd_elbo_kernel(%arg0: i32, %arg1: memref<8x32xf32, #tpu.memory_space<vmem>>, %arg2: memref<16x32xf32, #tpu.memory_space<vmem>>, %arg3: memref<1x32xf32, #tpu.memory_space<vmem>>, %arg4: memref<1x16xf32, #tpu.memory_space<vmem>>, %arg5: memref<8x16xf32, #tpu.memory_space<vmem>>, %arg6: memref<8x16xf32, #tpu.memory_space<vmem>>, %arg7: memref<8x2xf32, #tpu.memory_space<vmem>>) attributes {dimension_semantics = [#tpu.dimension_semantics<parallel>], iteration_bounds = array<i64: 1>, scalar_prefetch = 0 : i64, scratch_operands = 0 : i64, tpu.core_type = #tpu.core_type<tc>, window_params = [{transform_indices = @transform_0, window_bounds = array<i64: 8, 32>}, {pipeline_mode = #tpu.pipeline_mode<synchronous>, transform_indices = @transform_1, window_bounds = array<i64: 16, 32>}, {pipeline_mode = #tpu.pipeline_mode<synchronous>, transform_indices = @transform_2, window_bounds = array<i64: 1, 32>}, {pipeline_mode = #tpu.pipeline_mode<synchronous>, transform_indices = @transform_3, window_bounds = array<i64: 1, 16>}, {transform_indices = @transform_4, window_bounds = array<i64: 8, 16>}, {transform_indices = @transform_5, window_bounds = array<i64: 8, 16>}, {transform_indices = @transform_6, window_bounds = array<i64: 8, 2>}]} {
    %c0 = arith.constant 0 : index
    %c0_0 = arith.constant 0 : index
    %0 = vector.load %arg1[%c0, %c0_0] : memref<8x32xf32, #tpu.memory_space<vmem>>, vector<8x32xf32>
    %c0_1 = arith.constant 0 : index
    %c0_2 = arith.constant 0 : index
    %1 = vector.load %arg2[%c0_1, %c0_2] : memref<16x32xf32, #tpu.memory_space<vmem>>, vector<16x32xf32>
    %c0_3 = arith.constant 0 : index
    %c0_4 = arith.constant 0 : index
    %2 = vector.load %arg3[%c0_3, %c0_4] : memref<1x32xf32, #tpu.memory_space<vmem>>, vector<1x32xf32>
    %cst = arith.constant -2.000000e+01 : f32
    %cst_5 = arith.constant 2.000000e+00 : f32
    %3 = vector.broadcast %cst : f32 to vector<1x32xf32>
    %4 = arith.maximumf %3, %2 : vector<1x32xf32>
    %5 = vector.broadcast %cst_5 : f32 to vector<1x32xf32>
    %6 = arith.minimumf %5, %4 : vector<1x32xf32>
    %c0_6 = arith.constant 0 : index
    %c0_7 = arith.constant 0 : index
    %7 = vector.load %arg4[%c0_6, %c0_7] : memref<1x16xf32, #tpu.memory_space<vmem>>, vector<1x16xf32>
    %cst_8 = arith.constant -2.000000e+00 : f32
    %8 = vector.broadcast %cst_8 : f32 to vector<1x32xf32>
    %9 = arith.mulf %8, %6 : vector<1x32xf32>
    %10 = math.exp %9 : vector<1x32xf32>
    %cst_9 = arith.constant dense<0.000000e+00> : vector<32xf32>
    %11 = vector.multi_reduction <add>, %1, %cst_9 [0] : vector<16x32xf32> to vector<32xf32>
    %12 = vector.shape_cast %11 : vector<32xf32> to vector<1x32xf32>
    %cst_10 = arith.constant 1.600000e+01 : f32
    %13 = vector.broadcast %cst_10 : f32 to vector<1x32xf32>
    %14 = arith.divf %12, %13 : vector<1x32xf32>
    %15 = vector.broadcast %14 : vector<1x32xf32> to vector<8x32xf32>
    %16 = arith.subf %0, %15 : vector<8x32xf32>
    %17 = vector.broadcast %14 : vector<1x32xf32> to vector<16x32xf32>
    %18 = arith.subf %1, %17 : vector<16x32xf32>
    %19 = arith.mulf %16, %16 : vector<8x32xf32>
    %20 = tpu.concatenate %19, %16 in 1 : vector<8x32xf32>, vector<8x32xf32> -> vector<8x64xf32>
    %21 = vector.shape_cast %10 : vector<1x32xf32> to vector<1x32xf32>
    %22 = vector.broadcast %21 : vector<1x32xf32> to vector<16x32xf32>
    %cst_11 = arith.constant -2.000000e+00 : f32
    %23 = vector.broadcast %cst_11 : f32 to vector<16x32xf32>
    %24 = arith.mulf %23, %18 : vector<16x32xf32>
    %25 = vector.broadcast %10 : vector<1x32xf32> to vector<16x32xf32>
    %26 = arith.mulf %24, %25 : vector<16x32xf32>
    %27 = tpu.concatenate %22, %26 in 1 : vector<16x32xf32>, vector<16x32xf32> -> vector<16x64xf32>
    %cst_12 = arith.constant dense<0.000000e+00> : vector<8x16xf32>
    %28 = tpu.matmul %20, %27, %cst_12 {dimension_numbers = #tpu.dot_dimension_numbers<[1], [1], [0], [0], [0, 0, 1, 0], [], []>} : vector<8x64xf32>, vector<16x64xf32>, vector<8x16xf32> -> vector<8x16xf32>
    %29 = arith.mulf %18, %18 : vector<16x32xf32>
    %cst_13 = arith.constant dense<0.000000e+00> : vector<1x16xf32>
    %30 = tpu.matmul %10, %29, %cst_13 {dimension_numbers = #tpu.dot_dimension_numbers<[1], [1], [0], [0], [0, 0, 1, 0], [], []>} : vector<1x32xf32>, vector<16x32xf32>, vector<1x16xf32> -> vector<1x16xf32>
    %31 = vector.broadcast %30 : vector<1x16xf32> to vector<8x16xf32>
    %32 = arith.addf %28, %31 : vector<8x16xf32>
    %cst_14 = arith.constant 0.000000e+00 : f32
    %33 = vector.broadcast %cst_14 : f32 to vector<8x16xf32>
    %34 = arith.maximumf %32, %33 : vector<8x16xf32>
    %35 = vector.shape_cast %6 : vector<1x32xf32> to vector<1x1x32xf32>
    %cst_15 = arith.constant dense<0.000000e+00> : vector<1xf32>
    %36 = vector.multi_reduction <add>, %35, %cst_15 [1, 2] : vector<1x1x32xf32> to vector<1xf32>
    %37 = vector.shape_cast %36 : vector<1xf32> to vector<1x1x1xf32>
    %38 = vector.extract %37[0, 0, 0] : f32 from vector<1x1x1xf32>
    %cst_16 = arith.constant 29.4060326 : f32
    %39 = arith.addf %38, %cst_16 : f32
    %cst_17 = arith.constant -5.000000e-01 : f32
    %40 = vector.broadcast %cst_17 : f32 to vector<8x16xf32>
    %41 = arith.mulf %40, %34 : vector<8x16xf32>
    %42 = vector.broadcast %39 : f32 to vector<8x16xf32>
    %43 = arith.subf %41, %42 : vector<8x16xf32>
    %cst_18 = arith.constant dense<0xFF800000> : vector<1xf32>
    %44 = vector.multi_reduction <maximumf>, %7, %cst_18 [1] : vector<1x16xf32> to vector<1xf32>
    %45 = vector.shape_cast %44 : vector<1xf32> to vector<1x1xf32>
    %46 = vector.broadcast %45 : vector<1x1xf32> to vector<1x16xf32>
    %47 = arith.subf %7, %46 : vector<1x16xf32>
    %48 = math.exp %47 : vector<1x16xf32>
    %cst_19 = arith.constant dense<0.000000e+00> : vector<1xf32>
    %49 = vector.multi_reduction <add>, %48, %cst_19 [1] : vector<1x16xf32> to vector<1xf32>
    %50 = vector.shape_cast %49 : vector<1xf32> to vector<1x1xf32>
    %51 = math.log %50 : vector<1x1xf32>
    %52 = arith.addf %45, %51 : vector<1x1xf32>
    %53 = vector.broadcast %52 : vector<1x1xf32> to vector<1x16xf32>
    %54 = arith.subf %7, %53 : vector<1x16xf32>
    %55 = vector.broadcast %54 : vector<1x16xf32> to vector<8x16xf32>
    %56 = arith.addf %43, %55 : vector<8x16xf32>
    %cst_20 = arith.constant dense<0xFF800000> : vector<8xf32>
    %57 = vector.multi_reduction <maximumf>, %56, %cst_20 [1] : vector<8x16xf32> to vector<8xf32>
    %58 = vector.shape_cast %57 : vector<8xf32> to vector<8x1xf32>
    %59 = vector.broadcast %58 : vector<8x1xf32> to vector<8x16xf32>
    %60 = arith.subf %56, %59 : vector<8x16xf32>
    %61 = math.exp %60 : vector<8x16xf32>
    %cst_21 = arith.constant dense<0.000000e+00> : vector<8xf32>
    %62 = vector.multi_reduction <add>, %61, %cst_21 [1] : vector<8x16xf32> to vector<8xf32>
    %63 = vector.shape_cast %62 : vector<8xf32> to vector<8x1xf32>
    %64 = math.log %63 : vector<8x1xf32>
    %65 = arith.addf %58, %64 : vector<8x1xf32>
    %66 = vector.broadcast %65 : vector<8x1xf32> to vector<8x16xf32>
    %67 = arith.subf %56, %66 : vector<8x16xf32>
    %68 = math.exp %67 : vector<8x16xf32>
    %69 = arith.mulf %68, %43 : vector<8x16xf32>
    %cst_22 = arith.constant dense<0.000000e+00> : vector<8xf32>
    %70 = vector.multi_reduction <add>, %69, %cst_22 [1] : vector<8x16xf32> to vector<8xf32>
    %71 = vector.shape_cast %70 : vector<8xf32> to vector<8x1xf32>
    %72 = vector.broadcast %54 : vector<1x16xf32> to vector<8x16xf32>
    %73 = arith.subf %67, %72 : vector<8x16xf32>
    %74 = arith.mulf %68, %73 : vector<8x16xf32>
    %cst_23 = arith.constant dense<0.000000e+00> : vector<8xf32>
    %75 = vector.multi_reduction <add>, %74, %cst_23 [1] : vector<8x16xf32> to vector<8xf32>
    %76 = vector.shape_cast %75 : vector<8xf32> to vector<8x1xf32>
    %c0_24 = arith.constant 0 : index
    %c0_25 = arith.constant 0 : index
    %77 = vector.load %arg5[%c0_24, %c0_25] : memref<8x16xf32, #tpu.memory_space<vmem>>, vector<8x16xf32>
    tpu.vector_store %arg5[%c0_24, %c0_25], %68 {strides = array<i32>} : memref<8x16xf32, #tpu.memory_space<vmem>>, vector<8x16xf32>,
    %c0_26 = arith.constant 0 : index
    %c0_27 = arith.constant 0 : index
    %78 = vector.load %arg6[%c0_26, %c0_27] : memref<8x16xf32, #tpu.memory_space<vmem>>, vector<8x16xf32>
    tpu.vector_store %arg6[%c0_26, %c0_27], %43 {strides = array<i32>} : memref<8x16xf32, #tpu.memory_space<vmem>>, vector<8x16xf32>,
    %79 = tpu.concatenate %71, %76 in 1 : vector<8x1xf32>, vector<8x1xf32> -> vector<8x2xf32>
    %c0_28 = arith.constant 0 : index
    %c0_29 = arith.constant 0 : index
    %80 = vector.load %arg7[%c0_28, %c0_29] : memref<8x2xf32, #tpu.memory_space<vmem>>, vector<8x2xf32>
    tpu.vector_store %arg7[%c0_28, %c0_29], %79 {strides = array<i32>} : memref<8x2xf32, #tpu.memory_space<vmem>>, vector<8x2xf32>,
    return
  }
  func.func @transform_0(%arg0: i32) -> (i32, i32) {
    %c0_i32 = arith.constant 0 : i32
    %c0_i32_0 = arith.constant 0 : i32
    return %arg0, %c0_i32 : i32, i32
  }
  func.func @transform_1(%arg0: i32) -> (i32, i32) {
    %c0_i32 = arith.constant 0 : i32
    %c0_i32_0 = arith.constant 0 : i32
    %c0_i32_1 = arith.constant 0 : i32
    return %c0_i32, %c0_i32_0 : i32, i32
  }
  func.func @transform_2(%arg0: i32) -> (i32, i32) {
    %c0_i32 = arith.constant 0 : i32
    %c0_i32_0 = arith.constant 0 : i32
    %c0_i32_1 = arith.constant 0 : i32
    return %c0_i32, %c0_i32_0 : i32, i32
  }
  func.func @transform_3(%arg0: i32) -> (i32, i32) {
    %c0_i32 = arith.constant 0 : i32
    %c0_i32_0 = arith.constant 0 : i32
    %c0_i32_1 = arith.constant 0 : i32
    return %c0_i32, %c0_i32_0 : i32, i32
  }
  func.func @transform_4(%arg0: i32) -> (i32, i32) {
    %c0_i32 = arith.constant 0 : i32
    %c0_i32_0 = arith.constant 0 : i32
    return %arg0, %c0_i32 : i32, i32
  }
  func.func @transform_5(%arg0: i32) -> (i32, i32) {
    %c0_i32 = arith.constant 0 : i32
    %c0_i32_0 = arith.constant 0 : i32
    return %arg0, %c0_i32 : i32, i32
  }
  func.func @transform_6(%arg0: i32) -> (i32, i32) {
    %c0_i32 = arith.constant 0 : i32
    %c0_i32_0 = arith.constant 0 : i32
    return %arg0, %c0_i32 : i32, i32
  }
}

</mosaic_0001>

<bundles_post_ra>
// kernel: tpu_custom_call.1
= control target key start
LH: loop header
LB: loop body
LE: loop exit
PB: predicated region body
PF: predicated region fallthrough
CT: control target
= control target key end

     0   :  { %12 = vsyncpa [#allocation3], 0  ;;  %s659_s0 = inlined_call_operand.hbm [shape: f32[8,32], index: 0, kind: input, shape index: {}]   ;;  %s660_s1 = inlined_call_operand.hbm [shape: f32[16,32], index: 1, kind: input, shape index: {}]   ;;  %s661_s2 = inlined_call_operand.vmem [shape: f32[1,32], index: 2, kind: input, shape index: {}]   ;;  %s662_s3 = inlined_call_operand.vmem [shape: f32[1,16], index: 3, kind: input, shape index: {}]   ;;  %s663_s4 = inlined_call_operand.hbm [shape: f32[8,16], index: 4, kind: output, shape index: {0}]   ;;  %s664_s5 = inlined_call_operand.hbm [shape: f32[8,16], index: 5, kind: output, shape index: {1}]   ;;  %s665_s6 = inlined_call_operand.vmem [shape: f32[8,2], index: 6, kind: output, shape index: {2}]  }
   0x1   :  { %13 = vsyncpa [#allocation6], 0 }
   0x2   :  { %14 = vsyncpa [#allocation4], 0 }
   0x3   :  { %15 = vsyncpa [#allocation9], 0  ;;  %s524_s21 = smov [#allocation2]   ;;  %s525_s23 = smov [#allocation5]  }
   0x4   :  { %s22_s22 = sshll.u32 %s524_s21, 4  ;;  %s31_s24 = sshll.u32 %s525_s23, 4  ;;  %s23_s22 = int_to_ptr.vmem [resolvable:$true] %s22_s22  ;;  %s569_s24 = int_to_ptr.vmem [resolvable:$true] %s31_s24 }
   0x5   :  { %s428_s27 = scalar_lea.hbm %s659_s0, 128 }
   0x6   :  { %p429_p0 = scmp.ne.s32.totalorder %s659_s0, %s428_s27  ;;  %p432_p1 = scmp.lt.u32.totalorder %s428_s27, %s659_s0 }
   0x8   :  { %p434_p2 = pnand %p432_p1, %p429_p0 }
   0xa   :  { %437 = shalt.err (!%p434_p2)
}
   0xb   :  { %s438_s8 = scalar_lea.vmem %s23_s22, 128  ;;  %p443_p4 = scmp.lt.s32.totalorder %s23_s22, %s23_s22 }
   0xc   :  { %p439_p3 = scmp.ne.s32.totalorder %s23_s22, %s438_s8  ;;  %p444_p5 = scmp.lt.s32.totalorder %s438_s8, %s438_s8 }
   0xe   :  { %p445_p6 = por %p444_p5, %p443_p4 }
  0x10   :  { %p446_p7 = pnand %p445_p6, %p439_p3 }
  0x12   :  { %449 = shalt.err (!%p446_p7)
}
  0x13   :  { %25 = dma.hbm_to_vmem [thread:$0]  %s659_s0, 128, %s23_s22, [#allocation3]  }
  0x14   :  { %s450_s13 = scalar_lea.hbm %s660_s1, 256 }
  0x15   :  { %p451_p8 = scmp.ne.s32.totalorder %s660_s1, %s450_s13  ;;  %p454_p9 = scmp.lt.u32.totalorder %s450_s13, %s660_s1 }
  0x17   :  { %p456_p10 = pnand %p454_p9, %p451_p8 }
  0x19   :  { %459 = shalt.err (!%p456_p10)
}
  0x1a   :  { %s460_s18 = scalar_lea.vmem %s569_s24, 256  ;;  %p465_p12 = scmp.lt.s32.totalorder %s569_s24, %s569_s24 }
  0x1b   :  { %p461_p11 = scmp.ne.s32.totalorder %s569_s24, %s460_s18  ;;  %p466_p13 = scmp.lt.s32.totalorder %s460_s18, %s460_s18 }
  0x1d   :  { %p467_p0 = por %p466_p13, %p465_p12 }
  0x1f   :  { %p468_p1 = pnand %p467_p0, %p461_p11 }
  0x21   :  { %471 = shalt.err (!%p468_p1)
}
  0x22   :  { %s526_s0 = smov 128   ;;  %s527_s19 = smov 8  }
  0x23   :  { %37 = dma.hbm_to_vmem [thread:$0]  %s660_s1, 256, %s569_s24, [#allocation6], %s526_s0, %s526_s0, %s527_s19  }
  0x24   :  { %516 = dma.done.wait [#allocation3], 128  }
  0x25   :  { %517 = vsyncadd [#allocation3], 4294967168 }
  0x26   :  { %518 = dma.done.wait [#allocation6], 256  }
  0x27   :  { %519 = vsyncadd [#allocation6], 4294967040  ;;  %vm279_vm0 = vcmask 122880   ;;  %vm58_vm1 = vcmask 261120   ;;  %v603_v0 = vld [vmem:[%s662_s3] sm:$0x1]  ;;  %v80_v15 = vlaneseq }
  0x28   :  { %v49_v1 = vld [vmem:[#allocation5] sm:$0xff]  ;;  %v50_v2 = vld [vmem:[#allocation5 + $0x8] sm:$0xff]  ;;  %v280_v3 = vsel %vm279_vm0, %v603_v0, -inf  ;;  %v51_v4 = vld [vmem:[%s661_s2] sm:$0x1]  ;;  %v528_v20 = vmov 0.0|0.0  }
  0x29   :  { %v59_v5 = vsel %vm58_vm1, %v49_v1, 0.0  ;;  %v60_v6 = vsel %vm58_vm1, %v50_v2, 0.0  ;;  %281 = vmax.xlane.f32.xlu1 %v280_v3  ;;  %v52_v7 = vmax.f32 %v51_v4, -20.0  ;;  %v81_v18 = vshrl.u32 %v80_v15, 7  ;;  %391 = vmatprep.subr.bf16.mxu0 %v528_v20  ;;  %vm393_vm2 = vmpackc.low %vm58_vm1, %vm58_vm1  ;;  %v48_v35 = vld [vmem:[#allocation2] sm:$0xff]  ;;  %s531_s1 = smov 32  }
  0x2a   :  { %v61_v8 = vadd.f32 %v60_v6, %v59_v5  ;;  %395 = vmatprep.subr.bf16.mxu1 %v528_v20  ;;  %vm529_vm3 = vmmov 0   ;;  %v530_v31 = vmov 0.0   ;;  %vm264_vm4 = vcmask 253952   ;;  %s532_s24 = smov [#allocation7]   ;;  %s533_s28 = smov [#allocation8]  }
  0x2b   :  { %v53_v9 = vmin.f32 %v52_v7, 2.0  ;;  %v612_v22 = vsub.s32 0, %v81_v18  ;;  %381 = vmatprep.mubr.msk.f32.mxu0 %vm529_vm3, %v530_v31  ;;  %388 = vmatprep.mubr.msk.f32.mxu1 %vm529_vm3, %v530_v31  ;;  %vm183_vm5 = vcmask 523264   ;;  %vm300_vm7 = vcmask 130048   ;;  %s337_s27 = sshll.u32 %s532_s24, 4  ;;  %s347_s29 = sshll.u32 %s533_s28, 4  ;;  %s338_s27 = int_to_ptr.vmem [resolvable:$true] %s337_s27  ;;  %s348_s29 = int_to_ptr.vmem [resolvable:$true] %s347_s29 }
  0x2c   :  { %v62_v10 = vrot.slane %v61_v8, 4  ;;  %vm397_vm6 = vmpackc.low %vm183_vm5, %vm183_vm5  ;;  %s472_s30 = scalar_lea.vmem %s338_s27, 128  ;;  %p477_p3 = scmp.lt.s32.totalorder %s338_s27, %s338_s27 }
  0x2d   :  { %v55_v11 = vmul.f32 -2.0, %v53_v9  ;;  %v265_v38 = vsel %vm264_vm4, %v53_v9, 0.0  ;;  %p473_p2 = scmp.ne.s32.totalorder %s338_s27, %s472_s30  ;;  %p478_p4 = scmp.lt.s32.totalorder %s472_s30, %s472_s30 }
  0x2e   :  { %v63_v12 = vadd.f32 %v62_v10, %v61_v8  ;;  %266 = vadd.xlane.f32.xlu1 %v265_v38 }
  0x2f   :  { %v56_v13 = vmul.f32 1.442695, %v55_v11  ;;  %p479_p5 = por %p478_p4, %p477_p3 }
  0x30   :  { %v64_v14 = vrot.slane %v63_v12, 2 }
  0x31   :  { %416 = vpow2.f32 %v56_v13  ;;  %p480_p6 = pnand %p479_p5, %p473_p2 }
  0x32   :  { %v65_v16 = vadd.f32 %v64_v14, %v63_v12 }
  0x34   :  { %v66_v17 = vrot.slane %v65_v16, 1 }
  0x36   :  { %v67_v19 = vadd.f32 %v66_v17, %v65_v16 }
  0x38   :  { %v69_v21 = vmul.f32 0.0625, %v67_v19 }
  0x3a   :  { %v71_v23 = vsub.f32 %v49_v1, %v69_v21  ;;  %v72_v24 = vsub.f32 %v50_v2, %v69_v21  ;;  %v70_v37 = vsub.f32 %v48_v35, %v69_v21 }
  0x3b   :  { %v417_v25 = vpop.eup %416 }
  0x3c   :  { %v85_v26 = vmul.f32 -2.0, %v71_v23  ;;  %v86_v27 = vmul.f32 -2.0, %v72_v24  ;;  %v99_v28 = vmul.f32 %v71_v23, %v71_v23  ;;  %v83_v29 = vrot.slane %v417_v25, %v612_v22 }
  0x3d   :  { %v100_v30 = vmul.f32 %v72_v24, %v72_v24  ;;  %v73_v48 = vmul.f32 %v70_v37, %v70_v37 }
  0x3e   :  { %v87_v32 = vmul.f32 %v85_v26, %v83_v29  ;;  %v88_v33 = vmul.f32 %v86_v27, %v83_v29 }
  0x3f   :  { %v392_v34 = vpack.c.bf16 %v100_v30, %v99_v28 }
  0x40   :  { %v411_v36 = vpack.i.bf16 %v88_v33, %v87_v32 }
  0x41   :  { %394 = vmatpush3.bf16.xpose.msk.msra.mxu0 %vm393_vm2, %v392_v34 }
  0x42   :  { %412 = vrot.lane.b32.xlu0 %v411_v36, %s531_s1 }
  0x46   :  { %75 = vrot.lane.b32.xlu0 %v70_v37, %s531_s1 }
  0x48   :  { %382 = vmatmul.mubr.msk.f32.vlgmr.msra.gmra.mrb[0].mxu0 %vm58_vm1, %v417_v25 }
  0xb4   :  { %v413_v39 = vpop.permute.xlu0 %412 }
  0xb5   :  { %v415_v40 = vunpack.i.h.bf16 %v413_v39  ;;  %v414_v41 = vunpack.i.l.bf16 %v413_v39 }
  0xb6   :  { %v282_v42 = vpop.xlane.xlu1 %281 }
  0xb7   :  { %v283_v43 = vsub.f32 %v603_v0, %v282_v42  ;;  %v97_v44 = vsel %vm58_vm1, %v83_v29, %v414_v41  ;;  %v98_v45 = vsel %vm58_vm1, %v83_v29, %v415_v40 }
  0xb8   :  { %v396_v46 = vpack.c.bf16 %v98_v45, %v97_v44  ;;  %v76_v49 = vpop.permute.xlu0 %75 }
  0xb9   :  { %v284_v47 = vmul.f32 1.442695, %v283_v43  ;;  %v78_v50 = vsel %vm58_vm1, %v73_v48, %v76_v49 }
  0xba   :  { %398 = vmatpush3.bf16.xpose.msk.msra.mxu1 %vm397_vm6, %v396_v46 }
  0xbb   :  { %418 = vpow2.f32 %v284_v47  ;;  %v267_v53 = vpop.xlane.xlu1 %266 }
  0xbc   :  { %v268_v54 = vrot.slane %v267_v53, 4 }
  0xbe   :  { %v269_v55 = vadd.f32 %v268_v54, %v267_v53 }
  0xc0   :  { %v270_v56 = vrot.slane %v269_v55, 2 }
  0xc1   :  { %389 = vmatmul.mubr.msk.f32.vlgmr.msra.gmra.mrb[0].mxu1 %vm183_vm5, %v78_v50 }
  0xc2   :  { %v271_v57 = vadd.f32 %v270_v56, %v269_v55 }
  0xc4   :  { %v272_v58 = vrot.slane %v271_v57, 1 }
  0xc5   :  { %v419_v51 = vpop.eup %418 }
  0xc6   :  { %v286_v52 = vsel %vm279_vm0, %v419_v51, 0.0  ;;  %v273_v59 = vadd.f32 %v272_v58, %v271_v57 }
  0xc7   :  { %287 = vadd.xlane.f32.xlu0 %v286_v52 }
  0xc8   :  { %399 = vpush %v273_v59 }
  0xf9   :  { %s400_s2 = spop %399 }
  0xfa   :  { %s275_s3 = sadd.f32 29.406033, %s400_s2 }
  0xfc   :  { %v277_v10 = vstv %s275_s3 }
 0x11b   :  { %v175_v60 = vpop.f32.mrb[0].mxu0 }
 0x11c   :  { %v383_v61 = vpop.f32.mrb[1].mxu0  ;;  %v182_v2 = vrot.slane %v175_v60, %v612_v22 }
 0x154   :  { %v288_v62 = vpop.xlane.xlu0 %287 }
 0x155   :  { %420 = vlog2.f32 %v288_v62 }
 0x15f   :  { %v421_v63 = vpop.eup %420 }
 0x160   :  { %v290_v1 = vmul.f32 0.6931472, %v421_v63 }
 0x162   :  { %v291_v3 = vadd.f32 %v290_v1, %v282_v42 }
 0x164   :  { %v292_v7 = vsub.f32 %v603_v0, %v291_v3 }
 0x166   :  { %v297_v12 = vrot.slane %v292_v7, %v612_v22 }
 0x194   :  { %v259_v4 = vpop.f32.mrb[0].mxu1 }
 0x195   :  { %v260_v5 = vadd.f32 %v259_v4, %v182_v2  ;;  %v390_v6 = vpop.f32.mrb[1].mxu1 }
 0x197   :  { %v263_v8 = vmax.f32 %v260_v5, 0.0 }
 0x199   :  { %v276_v9 = vmul.f32 -0.5, %v263_v8 }
 0x19b   :  { %v278_v11 = vsub.f32 %v276_v9, %v277_v10 }
 0x19d   :  { %v299_v13 = vadd.f32 %v297_v12, %v278_v11  ;;  %326 = vst.msk [vmem:[#allocation8] sm:$0xff] %vm300_vm7, %v278_v11 }
 0x19f   :  { %v301_v14 = vsel %vm300_vm7, %v299_v13, -inf }
 0x1a0   :  { %302 = vmax.xlane.f32.xlu1 %v301_v14 }
 0x22d   :  { %v303_v15 = vpop.xlane.xlu1 %302 }
 0x22e   :  { %v304_v16 = vsub.f32 %v299_v13, %v303_v15 }
 0x230   :  { %v305_v17 = vmul.f32 1.442695, %v304_v16 }
 0x232   :  { %422 = vpow2.f32 %v305_v17 }
 0x23c   :  { %v423_v18 = vpop.eup %422 }
 0x23d   :  { %v307_v0 = vsel %vm300_vm7, %v423_v18, 0.0 }
 0x23e   :  { %308 = vadd.xlane.f32.xlu1 %v307_v0 }
 0x2cb   :  { %v309_v19 = vpop.xlane.xlu1 %308 }
 0x2cc   :  { %424 = vlog2.f32 %v309_v19 }
 0x2d6   :  { %v425_v20 = vpop.eup %424 }
 0x2d7   :  { %v311_v21 = vmul.f32 0.6931472, %v425_v20 }
 0x2d9   :  { %v312_v23 = vadd.f32 %v311_v21, %v303_v15 }
 0x2db   :  { %v313_v22 = vsub.f32 %v299_v13, %v312_v23 }
 0x2dd   :  { %v314_v24 = vmul.f32 1.442695, %v313_v22  ;;  %v320_v27 = vsub.f32 %v313_v22, %v297_v12 }
 0x2df   :  { %426 = vpow2.f32 %v314_v24 }
 0x2e9   :  { %v427_v25 = vpop.eup %426 }
 0x2ea   :  { %325 = vst.msk [vmem:[#allocation7] sm:$0xff] %vm300_vm7, %v427_v25  ;;  %v316_v26 = vmul.f32 %v427_v25, %v278_v11  ;;  %v321_v29 = vmul.f32 %v427_v25, %v320_v27 }
 0x2ec   :  { %v317_v28 = vsel %vm300_vm7, %v316_v26, 0.0  ;;  %v322_v30 = vsel %vm300_vm7, %v321_v29, 0.0 }
 0x2ed   :  { %318 = vadd.xlane.f32.xlu1 %v317_v28 }
 0x2f1   :  { %323 = vadd.xlane.f32.xlu1 %v322_v30 }
 0x2f2   :  { %483 = shalt.err (!%p480_p6)
}
 0x2f3   :  { %s484_s9 = scalar_lea.hbm %s663_s4, 128 }
 0x2f4   :  { %p485_p7 = scmp.ne.s32.totalorder %s663_s4, %s484_s9  ;;  %p488_p8 = scmp.lt.u32.totalorder %s484_s9, %s663_s4 }
 0x2f6   :  { %p490_p9 = pnand %p488_p8, %p485_p7 }
 0x2f8   :  { %493 = shalt.err (!%p490_p9)
}
 0x2f9   :  { %340 = dma.vmem_to_hbm [thread:$0]  %s338_s27, 128, %s663_s4, [#allocation4]  }
 0x2fa   :  { %s494_s16 = scalar_lea.vmem %s348_s29, 128  ;;  %p499_p11 = scmp.lt.s32.totalorder %s348_s29, %s348_s29 }
 0x2fb   :  { %p495_p10 = scmp.ne.s32.totalorder %s348_s29, %s494_s16  ;;  %p500_p12 = scmp.lt.s32.totalorder %s494_s16, %s494_s16 }
 0x2fd   :  { %p501_p13 = por %p500_p12, %p499_p11 }
 0x2ff   :  { %p502_p0 = pnand %p501_p13, %p495_p10 }
 0x301   :  { %505 = shalt.err (!%p502_p0)
}
 0x302   :  { %s506_s0 = scalar_lea.hbm %s664_s5, 128 }
 0x303   :  { %p507_p1 = scmp.ne.s32.totalorder %s664_s5, %s506_s0  ;;  %p510_p2 = scmp.lt.u32.totalorder %s506_s0, %s664_s5 }
 0x305   :  { %p512_p3 = pnand %p510_p2, %p507_p1 }
 0x307   :  { %515 = shalt.err (!%p512_p3)
}
 0x308   :  { %350 = dma.vmem_to_hbm [thread:$0]  %s348_s29, 128, %s664_s5, [#allocation9]   ;;  %vm327_vm8 = vcmask 7168   ;;  %vm329_vm9 = vcmask 15360  }
 0x37a   :  { %v319_v31 = vpop.xlane.xlu1 %318 }
 0x37e   :  { %v324_v32 = vpop.xlane.xlu1 %323 }
 0x37f   :  { %v328_v33 = vsel %vm327_vm8, %v319_v31, %v324_v32 }
 0x380   :  { %330 = vst.msk [vmem:[%s665_s6] sm:$0xff] %vm329_vm9, %v328_v33 }
 0x381   :  { %520 = dma.done.wait [#allocation4], 128  }
 0x382   :  { %521 = vsyncadd [#allocation4], 4294967168 }
 0x383   :  { %522 = dma.done.wait [#allocation9], 128  }
 0x384   :  { %523 = vsyncadd [#allocation9], 4294967168 }
 0x385   :  { %361 = vsyncpa [#allocation3], 1 }
 0x386   :  { %362 = vsyncpa [#allocation6], 1 }
 0x387   :  { %363 = vsyncpa [#allocation4], 1 }
 0x388   :  { %364 = vsyncpa [#allocation9], 1 }

</bundles_post_ra>
